<compile_context>
chip_gen: v7x
topology: tpu7x:2x2x1
jax: 0.10.0
libtpu: 0.0.40
codegen_flags: <defaults>
</compile_context>

<pallas_src>
import functools

import jax
import jax.numpy as jnp
from jax.experimental import pallas as pl
from jax.experimental.pallas import tpu as pltpu


# ----------------------------- kernel body ---------------------------------

def _clamp_kernel(x_ref, o_ref, *, min_val, max_val):
    # min_val / max_val are Python scalars -> VPU immediates; weak-type
    # promotion keeps the computation in x's dtype.
    o_ref[...] = jnp.minimum(jnp.maximum(x_ref[...], min_val), max_val)


# ----------------------------- tiling policy --------------------------------

_TARGET_BLOCK_BYTES = 2 << 20    # ~2 MiB per block buffer (HBM-roofline plateau)
_MAX_ROW_SLAB_BYTES = 4 << 20    # beyond this per min-row-slab, block lanes too
_SMALL_BYTES = 512 << 10         # <= this: a single full-array block
_MIN_GRID_STEPS = 4              # keep both v7x TensorCores fed on mid-size inputs
_VMEM_LIMIT = 32 << 20           # safe on v5e/v6e (128 MiB) and v7x (64 MiB)


def _sublane_multiple(itemsize):
    # 8 rows for 4-byte, 16 for 2-byte, 32 for 1-byte dtypes.
    return max(8, 32 // int(itemsize))


def _round_down(value, mult):
    return max(mult, (value // mult) * mult)


def _choose_2d_view(x):
    """Zero-copy collapse of x into a lane-friendly 2D (rows, cols) view."""
    total = int(x.size)
    shape = x.shape
    if x.ndim >= 2 and (shape[-1] >= 128 or total % 128 != 0):
        cols = shape[-1]          # full last dim (exempt from the 128 rule)
    elif total % 128 == 0:
        cols = 128                # dense lane-aligned view
    else:
        cols = total              # tiny / irregular: single row
    rows = total // cols
    return x.reshape(rows, cols), rows, cols


def _plan_block(rows, cols, itemsize):
    """Pick (tile_rows, tile_cols) giving ~2 MiB dtype-aware blocks."""
    sub = _sublane_multiple(itemsize)
    total_bytes = rows * cols * itemsize

    if total_bytes <= _SMALL_BYTES:
        return rows, cols                           # one full-array block

    row_bytes = cols * itemsize
    if row_bytes * sub <= _MAX_ROW_SLAB_BYTES:
        # Common case: full-width row slabs.
        tc = cols
        tr = _round_down(_TARGET_BLOCK_BYTES // row_bytes, sub)
        if rows >= _MIN_GRID_STEPS * sub:
            # Guarantee >= ~4 grid steps so v7x's two TCs both get work.
            tr = min(tr, _round_down(rows // _MIN_GRID_STEPS, sub))
        if tr >= rows:
            tr = rows
        return tr, tc

    # Extremely wide rows: block the lane dimension too (multiple of 128).
    tc = _round_down(_TARGET_BLOCK_BYTES // (itemsize * sub), 128)
    tc = min(tc, cols)
    tr = sub if rows > sub else rows
    return tr, tc


# ----------------------------- wrapper ---------------------------------------

def custom_clamp_pallas(x, min_val, max_val):
    """Elementwise clamp via Pallas. x: any shape; min/max: static Python scalars."""
    orig_shape = x.shape
    dtype = x.dtype
    if int(x.size) == 0:
        return x

    # Match the bound kind to the input dtype so nothing promotes out of x.dtype.
    # TODO(synk): if min/max ever become traced JAX scalars, route them through an
    # SMEM (1,1) scalar input instead of Python immediates.
    if jnp.issubdtype(dtype, jnp.integer):
        lo, hi = int(min_val), int(max_val)
    else:
        lo, hi = float(min_val), float(max_val)
    kernel = functools.partial(_clamp_kernel, min_val=lo, max_val=hi)

    x2d, rows, cols = _choose_2d_view(x)
    itemsize = jnp.dtype(dtype).itemsize
    tr, tc = _plan_block(rows, cols, itemsize)
    grid = (pl.cdiv(rows, tr), pl.cdiv(cols, tc))

    out2d = pl.pallas_call(
        kernel,
        out_shape=jax.ShapeDtypeStruct((rows, cols), dtype),
        grid_spec=pl.GridSpec(
            grid=grid,
            in_specs=[pl.BlockSpec((tr, tc), lambda i, j: (i, j))],
            out_specs=pl.BlockSpec((tr, tc), lambda i, j: (i, j)),
        ),
        compiler_params=pltpu.CompilerParams(
            # Independent blocks: "parallel" lets v7x shard the grid across its
            # two TensorCores; harmless on v5e/v6e (single TC).
            dimension_semantics=("parallel", "parallel"),
            vmem_limit_bytes=_VMEM_LIMIT,
        ),
    )(x2d)
    return out2d.reshape(orig_shape)


# Straight-through gradient, matching the PyTorch CustomClamp autograd.Function.
@functools.partial(jax.custom_vjp, nondiff_argnums=(1, 2))
def custom_clamp(x, min_val, max_val):
    return custom_clamp_pallas(x, min_val, max_val)


def _custom_clamp_fwd(x, min_val, max_val):
    return custom_clamp_pallas(x, min_val, max_val), None


def _custom_clamp_bwd(min_val, max_val, _residuals, g):
    return (g,)   # gradient is identity everywhere


custom_clamp.defvjp(_custom_clamp_fwd, _custom_clamp_bwd)


class CustomClampLayerPallas:
    """JAX/Pallas equivalent of the PyTorch CustomClampLayer module."""

    def __init__(self, min_val, max_val):
        self.min = min_val
        self.max = max_val

    def __call__(self, x):
        return custom_clamp(x, self.min, self.max)


# ----------------------------- self-test -------------------------------------

if __name__ == "__main__":
    key = jax.random.PRNGKey(0)
    layer = CustomClampLayerPallas(min_val=-1.0, max_val=1.0)

    # Small NCHW input matching the module's intended use: batch=2, channels=4,
    # spatial=16x16.  Collapses to a dense (16, 128) single-block path.
    x_small = jax.random.normal(key, (2, 4, 16, 16), dtype=jnp.float32) * 3.0
    out_small = jax.block_until_ready(layer(x_small))
    ref_small = jnp.clip(x_small, -1.0, 1.0)
    assert out_small.shape == x_small.shape and out_small.dtype == x_small.dtype
    assert jnp.allclose(out_small, ref_small), "mismatch vs reference clamp (small)"

    # Non-128-aligned last dim: zero-copy (600, 1000) view, row-blocked grid with a
    # partial trailing block (no pad, no output slice).
    x_big = jax.random.normal(jax.random.PRNGKey(1), (2, 3, 100, 1000),
                              dtype=jnp.float32) * 3.0
    out_big = jax.block_until_ready(layer(x_big))
    assert out_big.shape == x_big.shape and out_big.dtype == x_big.dtype
    assert jnp.allclose(out_big, jnp.clip(x_big, -1.0, 1.0)), "mismatch (tiled)"

    # bf16 input: exercises dtype-aware bounds / sublane handling.
    x_bf16 = (jax.random.normal(jax.random.PRNGKey(2), (2, 4, 16, 16)) * 3.0
              ).astype(jnp.bfloat16)
    out_bf16 = jax.block_until_ready(layer(x_bf16))
    assert out_bf16.dtype == jnp.bfloat16
    assert jnp.allclose(out_bf16, jnp.clip(x_bf16, -1.0, 1.0)), "mismatch (bf16)"

    print("KERNEL_OK")
</pallas_src>

<mosaic_0001>
module attributes {stable_mosaic.version = 11 : i64} {
  func.func @_clamp_kernel(%arg0: i32, %arg1: i32, %arg2: memref<16x128xf32, #tpu.memory_space<vmem>>, %arg3: memref<16x128xf32, #tpu.memory_space<vmem>>) attributes {dimension_semantics = [#tpu.dimension_semantics<parallel>, #tpu.dimension_semantics<parallel>], iteration_bounds = array<i64: 1, 1>, scalar_prefetch = 0 : i64, scratch_operands = 0 : i64, tpu.core_type = #tpu.core_type<tc>, window_params = [{transform_indices = @transform_0, window_bounds = array<i64: 16, 128>}, {transform_indices = @transform_1, window_bounds = array<i64: 16, 128>}]} {
    %c0 = arith.constant 0 : index
    %c0_0 = arith.constant 0 : index
    %0 = vector.load %arg2[%c0, %c0_0] : memref<16x128xf32, #tpu.memory_space<vmem>>, vector<16x128xf32>
    %cst = arith.constant -1.000000e+00 : f32
    %1 = vector.broadcast %cst : f32 to vector<16x128xf32>
    %2 = arith.maximumf %0, %1 : vector<16x128xf32>
    %cst_1 = arith.constant 1.000000e+00 : f32
    %3 = vector.broadcast %cst_1 : f32 to vector<16x128xf32>
    %4 = arith.minimumf %2, %3 : vector<16x128xf32>
    %c0_2 = arith.constant 0 : index
    %c0_3 = arith.constant 0 : index
    %5 = vector.load %arg3[%c0_2, %c0_3] : memref<16x128xf32, #tpu.memory_space<vmem>>, vector<16x128xf32>
    tpu.vector_store %arg3[%c0_2, %c0_3], %4 {strides = array<i32>} : memref<16x128xf32, #tpu.memory_space<vmem>>, vector<16x128xf32>,
    return
  }
  func.func @transform_0(%arg0: i32, %arg1: i32) -> (i32, i32) {
    %c0_i32 = arith.constant 0 : i32
    return %arg0, %arg1 : i32, i32
  }
  func.func @transform_1(%arg0: i32, %arg1: i32) -> (i32, i32) {
    %c0_i32 = arith.constant 0 : i32
    return %arg0, %arg1 : i32, i32
  }
}

</mosaic_0001>

<bundles_post_ra>
// kernel: tpu_custom_call.1
= control target key start
LH: loop header
LB: loop body
LE: loop exit
PB: predicated region body
PF: predicated region fallthrough
CT: control target
= control target key end

     0   :  { %6 = vsyncpa [#allocation3], 0  ;;  %s140_s0 = inlined_call_operand.hbm [shape: f32[16,128], index: 0, kind: input, shape index: {}]   ;;  %s141_s1 = inlined_call_operand.hbm [shape: f32[16,128], index: 1, kind: output, shape index: {}]  }
   0x1   :  { %7 = vsyncpa [#allocation4], 0  ;;  %s102_s6 = smov [#allocation2]   ;;  %s54_s10 = scalar_lea.hbm %s140_s0, 256 }
   0x2   :  { %s13_s7 = sshll.u32 %s102_s6, 4  ;;  %p55_p0 = scmp.ne.s32.totalorder %s140_s0, %s54_s10  ;;  %s14_s7 = int_to_ptr.vmem [resolvable:$true] %s13_s7 }
   0x3   :  { %p58_p1 = scmp.lt.u32.totalorder %s54_s10, %s140_s0 }
   0x5   :  { %p60_p2 = pnand %p58_p1, %p55_p0 }
   0x7   :  { %63 = shalt.err (!%p60_p2)
}
   0x8   :  { %s64_s15 = scalar_lea.vmem %s14_s7, 256  ;;  %p69_p4 = scmp.lt.s32.totalorder %s14_s7, %s14_s7 }
   0x9   :  { %p65_p3 = scmp.ne.s32.totalorder %s14_s7, %s64_s15  ;;  %p70_p5 = scmp.lt.s32.totalorder %s64_s15, %s64_s15 }
   0xb   :  { %p71_p6 = por %p70_p5, %p69_p4 }
   0xd   :  { %p72_p7 = pnand %p71_p6, %p65_p3 }
   0xf   :  { %75 = shalt.err (!%p72_p7)
}
  0x10   :  { %s103_s16 = smov 128   ;;  %s104_s17 = smov 8  }
  0x11   :  { %19 = dma.hbm_to_vmem [thread:$0]  %s140_s0, 256, %s14_s7, [#allocation3], %s103_s16, %s103_s16, %s104_s17  }
  0x12   :  { %98 = dma.done.wait [#allocation3], 256  }
  0x13   :  { %99 = vsyncadd [#allocation3], 4294967040  ;;  %s105_s20 = smov [#allocation5]   ;;  %v23_v0 = vld [vmem:[#allocation2] sm:$0xff]  ;;  %v24_v1 = vld [vmem:[#allocation2 + $0x8] sm:$0xff] }
  0x14   :  { %s36_s21 = sshll.u32 %s105_s20, 4  ;;  %v48_v2 = vclamps-f32 %v23_v0, 1.0  ;;  %v49_v3 = vclamps-f32 %v24_v1, 1.0  ;;  %s37_s21 = int_to_ptr.vmem [resolvable:$true] %s36_s21 }
  0x15   :  { %s76_s22 = scalar_lea.vmem %s37_s21, 256  ;;  %p81_p9 = scmp.lt.s32.totalorder %s37_s21, %s37_s21 }
  0x16   :  { %29 = vst [vmem:[#allocation5] sm:$0xff] %v48_v2  ;;  %30 = vst [vmem:[#allocation5 + $0x8] sm:$0xff] %v49_v3  ;;  %p77_p8 = scmp.ne.s32.totalorder %s37_s21, %s76_s22  ;;  %p82_p10 = scmp.lt.s32.totalorder %s76_s22, %s76_s22 }
  0x18   :  { %p83_p11 = por %p82_p10, %p81_p9 }
  0x1a   :  { %p84_p12 = pnand %p83_p11, %p77_p8 }
  0x1c   :  { %87 = shalt.err (!%p84_p12)
}
  0x1d   :  { %s88_s24 = scalar_lea.hbm %s141_s1, 256 }
  0x1e   :  { %p89_p13 = scmp.ne.s32.totalorder %s141_s1, %s88_s24  ;;  %p92_p0 = scmp.lt.u32.totalorder %s88_s24, %s141_s1 }
  0x20   :  { %p94_p1 = pnand %p92_p0, %p89_p13 }
  0x22   :  { %97 = shalt.err (!%p94_p1)
}
  0x23   :  { %42 = dma.vmem_to_hbm [thread:$0]  %s37_s21, 256, %s141_s1, [#allocation4], %s103_s16, %s103_s16, %s104_s17  }
  0x24   :  { %100 = dma.done.wait [#allocation4], 256  }
  0x25   :  { %101 = vsyncadd [#allocation4], 4294967040 }
  0x26   :  { %46 = vsyncpa [#allocation3], 1 }
  0x27   :  { %47 = vsyncpa [#allocation4], 1 }

</bundles_post_ra>
